<compile_context>
chip_gen: v5e
topology: v5e:2x2
jax: 0.10.0
libtpu: 0.0.40
codegen_flags: <defaults>
</compile_context>

<pallas_src>
import functools
import math

import jax
import jax.numpy as jnp
import numpy as np
from jax.experimental import pallas as pl
from jax.experimental.pallas import tpu as pltpu

SUB = 8            # sublanes per f32 vreg tile
LANE = 128         # lanes per vreg tile
NCORES = 2         # leading "parallel" grid axis (megacore on v7x)
DEFAULT_BS = 4096  # rows per block (4096 x 128 x 4B = 2 MiB per f32 block)
VMEM_LIMIT = 32 * 1024 * 1024


def _wing_loss_kernel(x_ref, t_ref, o_ref, *, w, inv_e, C, rows_per_core, bs,
                      need_mask):
    k = pl.program_id(1)

    @pl.when(k == 0)
    def _():
        o_ref[...] = jnp.zeros_like(o_ref)

    # Upcast in-kernel (inputs may be bf16 in HBM -> half the HBM traffic).
    x = x_ref[0].astype(jnp.float32)   # (BS, 128)
    t = t_ref[0].astype(jnp.float32)

    # weight = ones_like(t); weight[t == -1] = 0; diff = weight * (x - t)
    diff = jnp.where(t == -1.0, 0.0, x - t)
    abs_diff = jnp.abs(diff)
    # flag = abs_diff < w ; y = flag*w*log(1+abs/e) + (1-flag)*(abs - C)
    y = jnp.where(abs_diff < w,
                  w * jnp.log(1.0 + abs_diff * inv_e),
                  abs_diff - C)

    def accumulate(vals):
        # (BS,128) -> (BS//8, 8, 128): vreg-aligned split, sum over leading
        # axis is pure vreg-wise VPU adds into the resident output block.
        o_ref[...] += vals.reshape(bs // SUB, SUB, LANE).sum(
            axis=0, keepdims=True)

    if need_mask:
        last = pl.num_programs(1) - 1

        @pl.when(k != last)
        def _():
            accumulate(y)

        @pl.when(k == last)
        def _():
            # Final block of this core's stream may extend past the real rows:
            # zero the garbage (mask stays downstream of every use of x/t).
            row_ids = k * bs + jax.lax.broadcasted_iota(jnp.int32, y.shape, 0)
            accumulate(jnp.where(row_ids < rows_per_core, y, 0.0))
    else:
        accumulate(y)


def wing_loss(x, t, w=10.0, e=2.0):
    """Pallas implementation of WingLoss.forward(x, t). Returns f32 scalar."""
    w = float(w)
    e = float(e)
    C = float(w - w * math.log(1.0 + w / e))
    inv_e = 1.0 / e

    xf = jnp.ravel(x)
    tf = jnp.ravel(t)
    # Keep f32 / bf16 as-is (bf16 upcast happens in-kernel); force others f32.
    if xf.dtype not in (jnp.float32, jnp.bfloat16):
        xf = xf.astype(jnp.float32)
    if tf.dtype not in (jnp.float32, jnp.bfloat16):
        tf = tf.astype(jnp.float32)

    n = xf.shape[0]
    tile = NCORES * SUB * LANE                     # 2048 elems
    n_pad = ((n + tile - 1) // tile) * tile
    pad = n_pad - n
    if pad:
        # Small pad (< 2048 elems) only when ragged; (x=0, t=-1) contributes
        # exactly 0: weight=0 -> diff=0 -> abs=0 < w -> w*log(1) = 0.
        xf = jnp.pad(xf, (0, pad), constant_values=0.0)
        tf = jnp.pad(tf, (0, pad), constant_values=-1.0)

    M = n_pad // LANE                  # total rows, multiple of 16
    m_half = M // NCORES               # rows per core, multiple of 8
    BS = min(DEFAULT_BS, m_half)       # block rows, multiple of 8
    kb = pl.cdiv(m_half, BS)
    need_mask = (m_half % BS) != 0

    x3 = xf.reshape(NCORES, m_half, LANE)
    t3 = tf.reshape(NCORES, m_half, LANE)

    kernel = functools.partial(
        _wing_loss_kernel,
        w=w, inv_e=inv_e, C=C, rows_per_core=m_half, bs=BS,
        need_mask=need_mask,
    )

    partials = pl.pallas_call(
        kernel,
        out_shape=jax.ShapeDtypeStruct((NCORES, SUB, LANE), jnp.float32),
        grid_spec=pltpu.PrefetchScalarGridSpec(
            num_scalar_prefetch=0,
            grid=(NCORES, kb),
            in_specs=[
                pl.BlockSpec((1, BS, LANE), lambda c, k: (c, k, 0)),
                pl.BlockSpec((1, BS, LANE), lambda c, k: (c, k, 0)),
            ],
            out_specs=pl.BlockSpec((1, SUB, LANE), lambda c, k: (c, 0, 0)),
        ),
        compiler_params=pltpu.CompilerParams(
            dimension_semantics=("parallel", "arbitrary"),
            vmem_limit_bytes=VMEM_LIMIT,
        ),
    )(x3, t3)

    # Tiny (2, 8, 128) partial-sum slab -> scalar in plain XLA.
    return jnp.sum(partials)


def _wing_loss_ref(x, t, w=10.0, e=2.0):
    """Plain-JAX reference mirroring the PyTorch forward."""
    C = w - w * np.log(1.0 + w / e)
    x = x.astype(jnp.float32)
    t = t.astype(jnp.float32)
    weight = jnp.where(t == -1.0, 0.0, 1.0)
    diff = weight * (x - t)
    abs_diff = jnp.abs(diff)
    flag = (abs_diff < w).astype(jnp.float32)
    y = flag * w * jnp.log(1.0 + abs_diff / e) + (1.0 - flag) * (abs_diff - C)
    return jnp.sum(y)


if __name__ == "__main__":
    key = jax.random.PRNGKey(0)
    k1, k2, k3 = jax.random.split(key, 3)

    shape = (2, 4, 16, 16)
    x = jax.random.normal(k1, shape, dtype=jnp.float32) * 3.0
    t = jax.random.normal(k2, shape, dtype=jnp.float32) * 3.0
    # mark some targets as "ignore" (-1), as the loss expects
    ignore = jax.random.bernoulli(k3, p=0.2, shape=shape)
    t = jnp.where(ignore, -1.0, t)

    out = wing_loss(x, t, w=10.0, e=2.0)
    out = jax.block_until_ready(out)

    ref = _wing_loss_ref(x, t, w=10.0, e=2.0)
    np.testing.assert_allclose(np.asarray(out), np.asarray(ref),
                               rtol=1e-5, atol=1e-3)

    print("KERNEL_OK")
</pallas_src>

<mosaic_0001>
module attributes {stable_mosaic.version = 11 : i64} {
  func.func @_wing_loss_kernel(%arg0: i32, %arg1: i32, %arg2: memref<1x8x128xf32, #tpu.memory_space<vmem>>, %arg3: memref<1x8x128xf32, #tpu.memory_space<vmem>>, %arg4: memref<1x8x128xf32, #tpu.memory_space<vmem>>) attributes {dimension_semantics = [#tpu.dimension_semantics<parallel>, #tpu.dimension_semantics<arbitrary>], iteration_bounds = array<i64: 2, 1>, scalar_prefetch = 0 : i64, scratch_operands = 0 : i64, tpu.core_type = #tpu.core_type<tc>, window_params = [{transform_indices = @transform_0, window_bounds = array<i64: 1, 8, 128>}, {transform_indices = @transform_1, window_bounds = array<i64: 1, 8, 128>}, {transform_indices = @transform_2, window_bounds = array<i64: 1, 8, 128>}]} {
    %c0_i32 = arith.constant 0 : i32
    %0 = arith.cmpi eq, %arg1, %c0_i32 : i32
    %1 = arith.extui %0 : i1 to i32
    %c0_i32_0 = arith.constant 0 : i32
    %2 = arith.cmpi ne, %1, %c0_i32_0 : i32
    scf.if %2 {
      %cst_19 = arith.constant 0.000000e+00 : f32
      %31 = vector.broadcast %cst_19 : f32 to vector<1x8x128xf32>
      %c0_20 = arith.constant 0 : index
      %c0_21 = arith.constant 0 : index
      %c0_22 = arith.constant 0 : index
      %32 = vector.load %arg4[%c0_20, %c0_21, %c0_22] : memref<1x8x128xf32, #tpu.memory_space<vmem>>, vector<1x8x128xf32>
      tpu.vector_store %arg4[%c0_20, %c0_21, %c0_22], %31 {strides = array<i32>} : memref<1x8x128xf32, #tpu.memory_space<vmem>>, vector<1x8x128xf32>,
    } else {
    }
    %c0 = arith.constant 0 : index
    %c0_1 = arith.constant 0 : index
    %c0_2 = arith.constant 0 : index
    %3 = vector.load %arg2[%c0, %c0_1, %c0_2] : memref<1x8x128xf32, #tpu.memory_space<vmem>>, vector<1x8x128xf32>
    %4 = vector.shape_cast %3 : vector<1x8x128xf32> to vector<8x128xf32>
    %c0_3 = arith.constant 0 : index
    %c0_4 = arith.constant 0 : index
    %c0_5 = arith.constant 0 : index
    %5 = vector.load %arg3[%c0_3, %c0_4, %c0_5] : memref<1x8x128xf32, #tpu.memory_space<vmem>>, vector<1x8x128xf32>
    %6 = vector.shape_cast %5 : vector<1x8x128xf32> to vector<8x128xf32>
    %cst = arith.constant -1.000000e+00 : f32
    %7 = vector.broadcast %cst : f32 to vector<8x128xf32>
    %8 = arith.cmpf oeq, %6, %7 : vector<8x128xf32>
    %9 = arith.subf %4, %6 : vector<8x128xf32>
    %cst_6 = arith.constant 0.000000e+00 : f32
    %10 = vector.broadcast %cst_6 : f32 to vector<8x128xf32>
    %11 = arith.select %8, %10, %9 : vector<8x128xi1>, vector<8x128xf32>
    %12 = math.absf %11 : vector<8x128xf32>
    %cst_7 = arith.constant 1.000000e+01 : f32
    %13 = vector.broadcast %cst_7 : f32 to vector<8x128xf32>
    %14 = arith.cmpf olt, %12, %13 : vector<8x128xf32>
    %cst_8 = arith.constant 5.000000e-01 : f32
    %15 = vector.broadcast %cst_8 : f32 to vector<8x128xf32>
    %16 = arith.mulf %12, %15 : vector<8x128xf32>
    %cst_9 = arith.constant 1.000000e+00 : f32
    %17 = vector.broadcast %cst_9 : f32 to vector<8x128xf32>
    %18 = arith.addf %17, %16 : vector<8x128xf32>
    %19 = math.log %18 : vector<8x128xf32>
    %cst_10 = arith.constant 1.000000e+01 : f32
    %20 = vector.broadcast %cst_10 : f32 to vector<8x128xf32>
    %21 = arith.mulf %20, %19 : vector<8x128xf32>
    %cst_11 = arith.constant -7.9175949 : f32
    %22 = vector.broadcast %cst_11 : f32 to vector<8x128xf32>
    %23 = arith.subf %12, %22 : vector<8x128xf32>
    %24 = arith.select %14, %21, %23 : vector<8x128xi1>, vector<8x128xf32>
    %c0_12 = arith.constant 0 : index
    %c0_13 = arith.constant 0 : index
    %c0_14 = arith.constant 0 : index
    %25 = vector.load %arg4[%c0_12, %c0_13, %c0_14] : memref<1x8x128xf32, #tpu.memory_space<vmem>>, vector<1x8x128xf32>
    %26 = vector.shape_cast %24 : vector<8x128xf32> to vector<1x8x128xf32>
    %cst_15 = arith.constant dense<0.000000e+00> : vector<8x128xf32>
    %27 = vector.multi_reduction <add>, %26, %cst_15 [0] : vector<1x8x128xf32> to vector<8x128xf32>
    %28 = vector.shape_cast %27 : vector<8x128xf32> to vector<1x8x128xf32>
    %29 = arith.addf %25, %28 : vector<1x8x128xf32>
    %c0_16 = arith.constant 0 : index
    %c0_17 = arith.constant 0 : index
    %c0_18 = arith.constant 0 : index
    %30 = vector.load %arg4[%c0_16, %c0_17, %c0_18] : memref<1x8x128xf32, #tpu.memory_space<vmem>>, vector<1x8x128xf32>
    tpu.vector_store %arg4[%c0_16, %c0_17, %c0_18], %29 {strides = array<i32>} : memref<1x8x128xf32, #tpu.memory_space<vmem>>, vector<1x8x128xf32>,
    return
  }
  func.func @transform_0(%arg0: i32, %arg1: i32) -> (i32, i32, i32) {
    %c0_i32 = arith.constant 0 : i32
    %c0_i32_0 = arith.constant 0 : i32
    return %arg0, %arg1, %c0_i32 : i32, i32, i32
  }
  func.func @transform_1(%arg0: i32, %arg1: i32) -> (i32, i32, i32) {
    %c0_i32 = arith.constant 0 : i32
    %c0_i32_0 = arith.constant 0 : i32
    return %arg0, %arg1, %c0_i32 : i32, i32, i32
  }
  func.func @transform_2(%arg0: i32, %arg1: i32) -> (i32, i32, i32) {
    %c0_i32 = arith.constant 0 : i32
    %c0_i32_0 = arith.constant 0 : i32
    %c0_i32_1 = arith.constant 0 : i32
    return %arg0, %c0_i32, %c0_i32_0 : i32, i32, i32
  }
}

</mosaic_0001>

<bundles_post_ra>
// kernel: tpu_custom_call.1
= control target key start
LH: loop header
LB: loop body
LE: loop exit
PB: predicated region body
PF: predicated region fallthrough
CT: control target
= control target key end

     0   :  { %7 = vsyncpa [#allocation3], 0  ;;  %s743_s0 = inlined_call_operand.hbm [shape: f32[2,8,128], index: 0, kind: input, shape index: {}]   ;;  %s744_s1 = inlined_call_operand.hbm [shape: f32[2,8,128], index: 1, kind: input, shape index: {}]   ;;  %s745_s2 = inlined_call_operand.hbm [shape: f32[2,8,128], index: 2, kind: output, shape index: {}]  }
   0x1   :  { %9 = vsyncpa [#allocation3 + $0x1], 0 }
   0x2   :  { %10 = vsyncpa [#allocation6], 0 }
   0x3   :  { %12 = vsyncpa [#allocation6 + $0x1], 0 }
   0x4   :  { %13 = vsyncpa [#allocation4], 0 }
   0x5   :  { %15 = vsyncpa [#allocation4 + $0x1], 0  ;;  %s610_s9 = smov 0   ;;  %s612_s10 = smov 0  }
   0x6   :  { %s614_s11 = smov 0   ;;  %s616_s12 = smov 0  }
   0x7   :  { %s618_s13 = smov 0   ;;  %s620_s14 = smov 0  }
   0x8 LB: > { %s360_s15 = sadd.s32 4294967295, %s593_s14   ;;  %s361_s16 = sadd.s32 4294967294, %s593_s14   ;;  %s593_s14 = sphi %s620_s14, %s21_s14   ;;  %s589_s13 = sphi %s618_s13, %s754_s13   ;;  %s585_s12 = sphi %s616_s12, %s753_s12   ;;  %s581_s11 = sphi %s614_s11, %s752_s11   ;;  %s577_s10 = sphi %s612_s10, %s751_s10   ;;  %s573_s9 = sphi %s610_s9, %s750_s9  }
   0x9   : > { %s33_s17 = sadd.s32 1, %s589_s13  ;;  %s42_s18 = sadd.s32 1, %s581_s11 }
   0xa   : > { %p35_p0 = scmp.ge.s32.totalorder %s33_s17, 2  ;;  %p49_p1 = scmp.ne.s32.totalorder %s581_s11, %s577_s10 }
   0xb   : > { %p50_p2 = scmp.eq.s32.totalorder %s593_s14, 0  ;;  %p55_p3 = scmp.ne.s32.totalorder %s577_s10, %s573_s9 }
   0xc   : > { %s756_s17 = smov (%p35_p0, %s33_s17), 0  ;;  %p56_p5 = scmp.eq.s32.totalorder %s360_s15, 0 }
   0xd   : > { %p651_p4 = por %p50_p2, %p49_p1  ;;  %s37_s20 = ssub.s32 %s589_s13, %s756_s17 }
   0xe   : > { %p107_p6 = scmp.eq.s32.totalorder %s360_s15, 1  ;;  %p40_p7 = scmp.eq.s32.totalorder %s37_s20, 0 }
   0xf   : > { %p657_p8 = por %p56_p5, %p55_p3  ;;  %p113_p10 = scmp.eq.s32.totalorder %s361_s16, 1 }
  0x10   : > { %p661_p9 = por %p107_p6, %p49_p1  ;;  %p363_p12 = scmp.ge.s32.totalorder %s593_s14, 2 }
  0x11   : > { %s666_s23 = scalar_select %p40_p7, %s581_s11, %s42_s18  }
  0x12   : > { %p668_p11 = por %p113_p10, %p55_p3  ;;  %p394_p13 = scmp.lt.s32.totalorder %s593_s14, 2 }
  0x13   : > { %s133_s25 = sand.u32 1, %s581_s11   ;;  %s365_s27 = sshll.u32 %s589_s13, 3 }
  0x14   : > { %s364_s26 = sshll.u32 %s133_s25, 3  ;;  %s142_s30 = scalar_lea.hbm %s743_s0, %s365_s27 }
  0x15   : > { %s137_s3 = scalar_lea.vmem [#allocation2], %s364_s26  ;;  %s144_s5 = sshll.u32 %s142_s30, 4  ;;  %s145_s5 = int_to_ptr.hbm [resolvable:$true] %s144_s5 }
  0x16   : > { %s146_s4 = sshll.u32 %s137_s3, 4  ;;  %p384_p0 = pnand %p394_p13, %p651_p4  ;;  %s147_s4 = int_to_ptr.vmem [resolvable:$true] %s146_s4 }
  0x17   : > { %p368_p1 = scmp.ge.s32.totalorder %s593_s14, 1  ;;  %p171_p2 = scmp.lt.s32.totalorder %s593_s14, 3 }
  0x18   : > { %s134_s6 = scalar_lea.sflag [#allocation3], %s133_s25  ;;  %s162_s15 = scalar_lea.hbm %s744_s1, %s365_s27 }
  0x19   : > { %386 = dma.hbm_to_vmem [thread:$0]  (!%p384_p0), %s145_s5, 128, %s147_s4, %s134_s6  }
  0x1a   : > { %p172_p3 = pnand %p368_p1, %p171_p2  ;;  %s157_s16 = scalar_lea.vmem [#allocation5], %s364_s26 }
  0x1b   : > { %s166_s18 = sshll.u32 %s157_s16, 4  ;;  %s164_s20 = sshll.u32 %s162_s15, 4  ;;  %s167_s18 = int_to_ptr.vmem [resolvable:$true] %s166_s18  ;;  %s165_s20 = int_to_ptr.hbm [resolvable:$true] %s164_s20 }
  0x1c   : > { %s154_s28 = scalar_lea.sflag [#allocation6], %s133_s25  ;;  %175 = sbr.rel (%p172_p3) target bundleno = 61 (0x3d), region = 28 }
  0x1d   : > { %389 = dma.hbm_to_vmem [thread:$0]  (!%p384_p0), %s165_s20, 128, %s167_s18, %s154_s28  }
  0x1e   : > { %s687_s19 = sand.u32 (!%p172_p3), 1, %s577_s10  }
  0x1f   : > { %s690_s29 = sshll.u32 (!%p172_p3), %s687_s19, 3  ;;  %s178_s30 = scalar_lea.sflag (!%p172_p3), [#allocation3], %s687_s19 }
  0x20   : > { %s181_s3 = scalar_lea.vmem (!%p172_p3), [#allocation2], %s690_s29 }
  0x21   : > { %560 = dma.done.wait (%p657_p8), %s178_s30, 128  }
  0x22   : > { %562 = vsyncadd (%p657_p8), %s178_s30, 4294967168  ;;  %s188_s25 = scalar_lea.sflag [#allocation6], %s687_s19  ;;  %s191_s26 = scalar_lea.vmem [#allocation5], %s690_s29 }
  0x23   : > { %564 = dma.done.wait (%p657_p8), %s188_s25, 128  }
  0x24   : > { %566 = vsyncadd (%p657_p8), %s188_s25, 4294967168  ;;  %v223_v0 = vld [vmem:[%s181_s3] sm:$0xff]  ;;  %v224_v1 = vld [vmem:[%s191_s26] sm:$0xff]  ;;  %s374_s27 = sshll.u32 %s585_s12, 3  ;;  %s217_s21 = scalar_lea.vmem [#allocation7], %s690_s29 }
  0x25   : > { %vm225_vm0 = vcmp.eq.f32.partialorder %v224_v1, -1.0  ;;  %v226_v2 = vsub.f32 %v223_v0, %v224_v1  ;;  %s252_s6 = scalar_lea.hbm %s745_s2, %s374_s27  ;;  %s254_s7 = sshll.u32 %s217_s21, 4  ;;  %s255_s7 = int_to_ptr.vmem [resolvable:$true] %s254_s7 }
  0x26   : > { %s256_s8 = sshll.u32 %s252_s6, 4  ;;  %s242_s15 = scalar_lea.sflag [#allocation4], %s687_s19  ;;  %s257_s8 = int_to_ptr.hbm [resolvable:$true] %s256_s8 }
  0x27   : > { %v227_v3 = vsel %vm225_vm0, 0.0, %v226_v2  ;;  %s521_s16 = sshra.s32 %s257_s8, 4  ;;  %s527_s28 = scalar_lea.hbm %s745_s2, 16  ;;  %s522_s16 = int_to_ptr.hbm [resolvable:$true] %s521_s16 }
  0x28   : > { %v228_v4 = vand.u32 2147483647, %v227_v3  ;;  %s523_s12 = scalar_lea.hbm %s522_s16, 8  ;;  %p528_p7 = scmp.lt.s32.totalorder %s522_s16, %s745_s2 }
  0x29   : > { %p524_p4 = scmp.ne.s32.totalorder %s522_s16, %s523_s12  ;;  %p529_p8 = scmp.lt.s32.totalorder %s527_s28, %s523_s12 }
  0x2a   : > { %v230_v5 = vmul.f32 0.5, %v228_v4  ;;  %v372_v9 = vadd.f32 7.917595, %v228_v4  ;;  %vm229_vm1 = vcmp.lt.f32.partialorder %v228_v4, 10.0 }
  0x2b   : > { %p525_p5 = pnand %p524_p4, %p661_p9  ;;  %p530_p10 = por %p529_p8, %p528_p7 }
  0x2c   : > { %v231_v6 = vadd.f32 1.0, %v230_v5 }
  0x2d   : > { %p526_p6 = pneg %p525_p5 }
  0x2e   : > { %445 = vlog2.f32 %v231_v6 }
  0x2f   : > { %p531_p13 = pnand %p530_p10, %p526_p6 }
  0x34   : > { %v446_v7 = vpop.eup %445 }
  0x35   : > { %v233_v8 = vmul.f32 0.6931472, %v446_v7 }
  0x37   : > { %v234_v10 = vmul.f32 10.0, %v233_v8 }
  0x39   : > { %v236_v11 = vsel %vm229_vm1, %v234_v10, %v372_v9 }
  0x3a   : > { %240 = vst [vmem:[%s217_s21] sm:$0xff] %v236_v11 }
  0x3b   : > { %534 = shalt.err (!%p531_p13)
}
  0x3c   : > { %381 = dma.vmem_to_hbm [thread:$0]  (%p661_p9), %s255_s7, 128, %s257_s8, %s242_s15  }
  0x3d PF: > { %s268_s19 = sand.u32 1, %s573_s9   ;;  %p391_p0 = pnand %p363_p12, %p668_p11 }
  0x3e   : > { %s269_s3 = scalar_lea.sflag [#allocation4], %s268_s19 }
  0x3f   : > { %p392_p1 = pneg %p391_p0 }
  0x41   : > { %568 = dma.done.wait (%p392_p1), %s269_s3, 128  }
  0x42   : > { %570 = vsyncadd (%p392_p1), %s269_s3, 4294967168  ;;  %s21_s14 = sadd.s32 1, %s593_s14   ;;  %s750_s9 = smov %s577_s10 }
  0x43   : > { %p18_p2 = scmp.ge.s32.totalorder %s21_s14, 4   ;;  %s751_s10 = smov %s581_s11 }
  0x44   : > { %s752_s11 = smov %s666_s23  ;;  %s753_s12 = smov %s589_s13 }
  0x45   : > { %s754_s13 = smov %s756_s17  ;;  %20 = sbr.rel (!%p18_p2) target bundleno = 8 (0x8), region = 90 }
  0x4a   :  { %275 = vsyncpa [#allocation3], 1 }
  0x4b   :  { %277 = vsyncpa [#allocation3 + $0x1], 1 }
  0x4c   :  { %278 = vsyncpa [#allocation6], 1 }
  0x4d   :  { %280 = vsyncpa [#allocation6 + $0x1], 1 }
  0x4e   :  { %281 = vsyncpa [#allocation4], 1 }
  0x4f   :  { %283 = vsyncpa [#allocation4 + $0x1], 1 }

</bundles_post_ra>
